<compile_context>
chip_gen: v7x
topology: tpu7x:2x2x1
jax: 0.10.0
libtpu: 0.0.40
codegen_flags: <defaults>
</compile_context>

<pallas_src>
import functools

import numpy as np
import jax
import jax.numpy as jnp
from jax import lax
from jax.experimental import pallas as pl
from jax.experimental.pallas import tpu as pltpu


def _round_up(x, m):
    return (x + m - 1) // m * m


# ---------------- parameter construction (deterministic, mirrors __init__) ----------------

def make_schedule(clock_periods, nstates):
    sch = []
    for c in clock_periods:
        for _ in range(nstates):
            sch.append(c)
    return sch


def recurrent_mask(nclocks, nstates):
    rows = []
    for c in range(nclocks, 0, -1):
        zero_blocks = np.zeros((nstates, nstates * (nclocks - c)))
        one_blocks = np.ones((nstates, nstates * c))
        rows.append(np.concatenate([zero_blocks, one_blocks], axis=1))
    return np.concatenate(rows, axis=0)


def _random(rng, m, n):
    return rng.standard_normal((m, n)).astype(np.float64)


def _glorotize(W):
    fan_out, fan_in = W.shape
    return W * np.sqrt(6.0 / (fan_in + fan_out))


def _orthogonalize(W):
    u, _, vt = np.linalg.svd(W, full_matrices=False)
    return u @ vt


def build_crnn_params(dinput, nstates, doutput, clock_periods, full_recurrence=False, seed=0):
    nclocks = len(clock_periods)
    C = nclocks * nstates
    rng = np.random.default_rng(seed)
    Wi = _glorotize(_random(rng, C, dinput + 1))
    Wh = _random(rng, C, C + 1)
    Wh[:, :-1] = _orthogonalize(Wh[:, :-1])
    Wo = _glorotize(_random(rng, doutput, C + 1))
    if not full_recurrence:
        Wh[:, :-1] *= recurrent_mask(nclocks, nstates)
    return (Wi.astype(np.float32), Wh.astype(np.float32), Wo.astype(np.float32))


# ---------------- Pallas kernel ----------------

def crnn_kernel(T, B_pad,
                x_ref, act_ref, wix_ref, whh_ref, bih_ref, woh_ref, bo_ref,
                ys_ref, hlast_ref, ih_scr, hist_scr):
    # Phase 1: input projection for ALL timesteps in a single MXU matmul.
    #   x_ref: (T*B_pad, Dp), wix_ref: (Dp, Cp), bih = bi + bh folded.
    ih_scr[...] = (jnp.dot(x_ref[...], wix_ref[...], preferred_element_type=jnp.float32)
                   + bih_ref[...])

    whh = whh_ref[...]  # hoist the recurrent weight load out of the loop

    # Phase 2: serial recurrence; only the (B_pad, Cp) @ (Cp, Cp) matmul is sequential.
    def step(t, h_prev):
        off = pl.multiple_of(t * B_pad, B_pad)
        i_h = ih_scr[pl.ds(off, B_pad), :]                        # (B_pad, Cp)
        h_h = jnp.dot(h_prev, whh, preferred_element_type=jnp.float32)
        h_new = jnp.tanh(i_h + h_h)
        act = act_ref[pl.ds(t, 1), :]                             # (1, Cp) clock mask
        h = jnp.where(act != 0.0, h_new, h_prev)                  # broadcast over batch
        hist_scr[pl.ds(off, B_pad), :] = h
        return h

    h_last = lax.fori_loop(0, T, step,
                           jnp.zeros(hlast_ref.shape, jnp.float32),
                           unroll=True)
    hlast_ref[...] = h_last                                       # single writeback

    # Phase 3: output projection + tanh for ALL timesteps in one matmul, lane-dense store.
    ys_ref[...] = jnp.tanh(
        jnp.dot(hist_scr[...], woh_ref[...], preferred_element_type=jnp.float32)
        + bo_ref[...])


def crnn_forward(x, Wi, Wh, Wo, clock_periods, nstates):
    """x: (T, B, dinput) float32. Returns (Ys (T,B,doutput), H_last (C,B)) matching PyTorch."""
    T, B, dinput = x.shape
    C = Wi.shape[0]
    doutput = Wo.shape[0]

    B_pad = _round_up(B, 8)
    Dp = _round_up(dinput, 128)
    Cp = _round_up(C, 128)
    Op = _round_up(doutput, 128)
    TB = T * B_pad

    # Weights: strip the trailing "ones" (bias) column, transpose to (K, N), zero-pad.
    wix = np.zeros((Dp, Cp), np.float32)
    wix[:dinput, :C] = np.asarray(Wi[:, :-1]).T
    whh = np.zeros((Cp, Cp), np.float32)
    whh[:C, :C] = np.asarray(Wh[:, :-1]).T
    woh = np.zeros((Cp, Op), np.float32)
    woh[:C, :doutput] = np.asarray(Wo[:, :-1]).T
    bih = np.zeros((1, Cp), np.float32)
    bih[0, :C] = np.asarray(Wi[:, -1]) + np.asarray(Wh[:, -1])    # fold bi + bh
    bo = np.zeros((1, Op), np.float32)
    bo[0, :doutput] = np.asarray(Wo[:, -1])

    # Clock activation mask (T, Cp): act[t, c] = (t % sched[c] == 0).  Broadcast over
    # batch happens inside the kernel, so we only ship T rows instead of T*B_pad.
    sched = np.array(make_schedule(clock_periods, nstates), dtype=np.int64)        # length C
    act_tc = np.zeros((T, Cp), np.float32)
    act_tc[:, :C] = (np.arange(T)[:, None] % sched[None, :] == 0).astype(np.float32)

    # Pad X and flatten (T, B_pad, Dp) -> (T*B_pad, Dp).
    x_pad = jnp.zeros((T, B_pad, Dp), jnp.float32).at[:, :B, :dinput].set(x)
    x_flat = x_pad.reshape(TB, Dp)

    kernel = functools.partial(crnn_kernel, T, B_pad)

    grid_spec = pltpu.PrefetchScalarGridSpec(
        num_scalar_prefetch=0,
        grid=(1,),
        in_specs=[
            pl.BlockSpec((TB, Dp), lambda i: (0, 0)),     # X (all timesteps)
            pl.BlockSpec((T, Cp), lambda i: (0, 0)),      # clock mask (per timestep)
            pl.BlockSpec((Dp, Cp), lambda i: (0, 0)),     # Wi^T
            pl.BlockSpec((Cp, Cp), lambda i: (0, 0)),     # Wh^T
            pl.BlockSpec((1, Cp), lambda i: (0, 0)),      # bi + bh
            pl.BlockSpec((Cp, Op), lambda i: (0, 0)),     # Wo^T
            pl.BlockSpec((1, Op), lambda i: (0, 0)),      # bo
        ],
        out_specs=[
            pl.BlockSpec((TB, Op), lambda i: (0, 0)),     # Ys (lane-dense slab)
            pl.BlockSpec((B_pad, Cp), lambda i: (0, 0)),  # H_last
        ],
        scratch_shapes=[
            pltpu.VMEM((TB, Cp), jnp.float32),            # i_h for all t
            pltpu.VMEM((TB, Cp), jnp.float32),            # H history for all t
        ],
    )

    ys_flat, h_last_p = pl.pallas_call(
        kernel,
        out_shape=(
            jax.ShapeDtypeStruct((TB, Op), jnp.float32),
            jax.ShapeDtypeStruct((B_pad, Cp), jnp.float32),
        ),
        grid_spec=grid_spec,
        compiler_params=pltpu.CompilerParams(dimension_semantics=("arbitrary",)),
    )(x_flat, jnp.asarray(act_tc), jnp.asarray(wix), jnp.asarray(whh),
      jnp.asarray(bih), jnp.asarray(woh), jnp.asarray(bo))

    ys = ys_flat.reshape(T, B_pad, Op)[:, :B, :doutput]
    h_last = h_last_p[:B, :C].T                            # (C, B) like the PyTorch module
    return ys, h_last


# ---------------- pure-JAX reference (mirrors the PyTorch forward loop) ----------------

def crnn_ref(x, Wi, Wh, Wo, clock_periods, nstates):
    T, B, _ = x.shape
    C = Wi.shape[0]
    sched = np.array(make_schedule(clock_periods, nstates), dtype=np.int64)
    H = jnp.zeros((C, B), jnp.float32)
    ys = []
    for t in range(T):
        active = jnp.asarray((t % sched == 0).astype(np.float32))[:, None]     # (C, 1)
        inp = jnp.concatenate([x[t].T, jnp.ones((1, B), jnp.float32)], 0)
        i_h = Wi @ inp
        _H_prev = jnp.concatenate([H, jnp.ones((1, B), jnp.float32)], 0)
        h_h = Wh @ _H_prev
        H_new = jnp.tanh(i_h + h_h)
        H = active * H_new + (1.0 - active) * H
        y = jnp.tanh(Wo @ jnp.concatenate([H, jnp.ones((1, B), jnp.float32)], 0))
        ys.append(y.T)
    return jnp.stack(ys), H


# ---------------- main ----------------

if __name__ == "__main__":
    # Small shapes consistent with the module.
    dinput, nstates, doutput = 16, 8, 16
    clock_periods = [1, 2, 4, 8]
    T, B = 8, 4
    C = len(clock_periods) * nstates   # 32

    Wi, Wh, Wo = build_crnn_params(dinput, nstates, doutput, clock_periods, seed=0)
    Wi_j, Wh_j, Wo_j = jnp.asarray(Wi), jnp.asarray(Wh), jnp.asarray(Wo)

    key = jax.random.PRNGKey(0)
    x = jax.random.normal(key, (T, B, dinput), dtype=jnp.float32)

    ys, h_last = crnn_forward(x, Wi_j, Wh_j, Wo_j, clock_periods, nstates)
    jax.block_until_ready((ys, h_last))

    ys_ref, h_ref = crnn_ref(x, Wi_j, Wh_j, Wo_j, clock_periods, nstates)
    assert ys.shape == (T, B, doutput) and h_last.shape == (C, B)
    np.testing.assert_allclose(np.asarray(ys), np.asarray(ys_ref), rtol=1e-3, atol=1e-3)
    np.testing.assert_allclose(np.asarray(h_last), np.asarray(h_ref), rtol=1e-3, atol=1e-3)

    print("KERNEL_OK")
</pallas_src>

<mosaic_0001>
module attributes {stable_mosaic.version = 11 : i64} {
  func.func @crnn_kernel(%arg0: i32, %arg1: memref<64x128xf32, #tpu.memory_space<vmem>>, %arg2: memref<8x128xf32, #tpu.memory_space<vmem>>, %arg3: memref<128x128xf32, #tpu.memory_space<vmem>>, %arg4: memref<128x128xf32, #tpu.memory_space<vmem>>, %arg5: memref<1x128xf32, #tpu.memory_space<vmem>>, %arg6: memref<128x128xf32, #tpu.memory_space<vmem>>, %arg7: memref<1x128xf32, #tpu.memory_space<vmem>>, %arg8: memref<64x128xf32, #tpu.memory_space<vmem>>, %arg9: memref<8x128xf32, #tpu.memory_space<vmem>>, %arg10: memref<64x128xf32, #tpu.memory_space<vmem>>, %arg11: memref<64x128xf32, #tpu.memory_space<vmem>>) attributes {dimension_semantics = [#tpu.dimension_semantics<arbitrary>], iteration_bounds = array<i64: 1>, scalar_prefetch = 0 : i64, scratch_operands = 2 : i64, tpu.core_type = #tpu.core_type<tc>, window_params = [{pipeline_mode = #tpu.pipeline_mode<synchronous>, transform_indices = @transform_0, window_bounds = array<i64: 64, 128>}, {pipeline_mode = #tpu.pipeline_mode<synchronous>, transform_indices = @transform_1, window_bounds = array<i64: 8, 128>}, {pipeline_mode = #tpu.pipeline_mode<synchronous>, transform_indices = @transform_2, window_bounds = array<i64: 128, 128>}, {pipeline_mode = #tpu.pipeline_mode<synchronous>, transform_indices = @transform_3, window_bounds = array<i64: 128, 128>}, {pipeline_mode = #tpu.pipeline_mode<synchronous>, transform_indices = @transform_4, window_bounds = array<i64: 1, 128>}, {pipeline_mode = #tpu.pipeline_mode<synchronous>, transform_indices = @transform_5, window_bounds = array<i64: 128, 128>}, {pipeline_mode = #tpu.pipeline_mode<synchronous>, transform_indices = @transform_6, window_bounds = array<i64: 1, 128>}, {pipeline_mode = #tpu.pipeline_mode<synchronous>, transform_indices = @transform_7, window_bounds = array<i64: 64, 128>}, {pipeline_mode = #tpu.pipeline_mode<synchronous>, transform_indices = @transform_8, window_bounds = array<i64: 8, 128>}]} {
    %c0 = arith.constant 0 : index
    %c0_0 = arith.constant 0 : index
    %0 = vector.load %arg1[%c0, %c0_0] : memref<64x128xf32, #tpu.memory_space<vmem>>, vector<64x128xf32>
    %c0_1 = arith.constant 0 : index
    %c0_2 = arith.constant 0 : index
    %1 = vector.load %arg3[%c0_1, %c0_2] : memref<128x128xf32, #tpu.memory_space<vmem>>, vector<128x128xf32>
    %cst = arith.constant dense<0.000000e+00> : vector<64x128xf32>
    %2 = tpu.matmul %0, %1, %cst {dimension_numbers = #tpu.dot_dimension_numbers<[1], [0], [0], [1], [0, 0, 1, 1], [], []>} : vector<64x128xf32>, vector<128x128xf32>, vector<64x128xf32> -> vector<64x128xf32>
    %c0_3 = arith.constant 0 : index
    %c0_4 = arith.constant 0 : index
    %3 = vector.load %arg5[%c0_3, %c0_4] : memref<1x128xf32, #tpu.memory_space<vmem>>, vector<1x128xf32>
    %4 = vector.broadcast %3 : vector<1x128xf32> to vector<64x128xf32>
    %5 = arith.addf %2, %4 : vector<64x128xf32>
    %c0_5 = arith.constant 0 : index
    %c0_6 = arith.constant 0 : index
    %6 = vector.load %arg10[%c0_5, %c0_6] : memref<64x128xf32, #tpu.memory_space<vmem>>, vector<64x128xf32>
    tpu.vector_store %arg10[%c0_5, %c0_6], %5 {strides = array<i32>} : memref<64x128xf32, #tpu.memory_space<vmem>>, vector<64x128xf32>,
    %c0_7 = arith.constant 0 : index
    %c0_8 = arith.constant 0 : index
    %7 = vector.load %arg4[%c0_7, %c0_8] : memref<128x128xf32, #tpu.memory_space<vmem>>, vector<128x128xf32>
    %cst_9 = arith.constant 0.000000e+00 : f32
    %8 = vector.broadcast %cst_9 : f32 to vector<8x128xf32>
    %c0_i32 = arith.constant 0 : i32
    %c8_i32 = arith.constant 8 : i32
    %9 = arith.muli %c0_i32, %c8_i32 : i32
    %10 = tpu.assume_multiple %9, 8 : i32
    %11 = arith.index_cast %10 : i32 to index
    %c0_10 = arith.constant 0 : index
    %12 = vector.load %arg10[%11, %c0_10] : memref<64x128xf32, #tpu.memory_space<vmem>>, vector<8x128xf32>
    %cst_11 = arith.constant dense<0.000000e+00> : vector<8x128xf32>
    %13 = tpu.matmul %8, %7, %cst_11 {dimension_numbers = #tpu.dot_dimension_numbers<[1], [0], [0], [1], [0, 0, 1, 1], [], []>} : vector<8x128xf32>, vector<128x128xf32>, vector<8x128xf32> -> vector<8x128xf32>
    %14 = arith.addf %12, %13 : vector<8x128xf32>
    %15 = math.tanh %14 : vector<8x128xf32>
    %16 = arith.index_cast %c0_i32 : i32 to index
    %c0_12 = arith.constant 0 : index
    %17 = vector.load %arg2[%16, %c0_12] : memref<8x128xf32, #tpu.memory_space<vmem>>, vector<1x128xf32>
    %cst_13 = arith.constant 0.000000e+00 : f32
    %18 = vector.broadcast %cst_13 : f32 to vector<1x128xf32>
    %19 = arith.cmpf one, %17, %18 : vector<1x128xf32>
    %20 = vector.shape_cast %19 : vector<1x128xi1> to vector<1x128xi1>
    %21 = vector.broadcast %20 : vector<1x128xi1> to vector<8x128xi1>
    %22 = arith.select %21, %15, %8 : vector<8x128xi1>, vector<8x128xf32>
    %23 = arith.index_cast %10 : i32 to index
    %c0_14 = arith.constant 0 : index
    %24 = vector.load %arg11[%23, %c0_14] : memref<64x128xf32, #tpu.memory_space<vmem>>, vector<8x128xf32>
    tpu.vector_store %arg11[%23, %c0_14], %22 {strides = array<i32>} : memref<64x128xf32, #tpu.memory_space<vmem>>, vector<8x128xf32>,
    %c1_i32 = arith.constant 1 : i32
    %c8_i32_15 = arith.constant 8 : i32
    %25 = arith.muli %c1_i32, %c8_i32_15 : i32
    %26 = tpu.assume_multiple %25, 8 : i32
    %27 = arith.index_cast %26 : i32 to index
    %c0_16 = arith.constant 0 : index
    %28 = vector.load %arg10[%27, %c0_16] : memref<64x128xf32, #tpu.memory_space<vmem>>, vector<8x128xf32>
    %cst_17 = arith.constant dense<0.000000e+00> : vector<8x128xf32>
    %29 = tpu.matmul %22, %7, %cst_17 {dimension_numbers = #tpu.dot_dimension_numbers<[1], [0], [0], [1], [0, 0, 1, 1], [], []>} : vector<8x128xf32>, vector<128x128xf32>, vector<8x128xf32> -> vector<8x128xf32>
    %30 = arith.addf %28, %29 : vector<8x128xf32>
    %31 = math.tanh %30 : vector<8x128xf32>
    %32 = arith.index_cast %c1_i32 : i32 to index
    %c0_18 = arith.constant 0 : index
    %33 = vector.load %arg2[%32, %c0_18] : memref<8x128xf32, #tpu.memory_space<vmem>>, vector<1x128xf32>
    %cst_19 = arith.constant 0.000000e+00 : f32
    %34 = vector.broadcast %cst_19 : f32 to vector<1x128xf32>
    %35 = arith.cmpf one, %33, %34 : vector<1x128xf32>
    %36 = vector.shape_cast %35 : vector<1x128xi1> to vector<1x128xi1>
    %37 = vector.broadcast %36 : vector<1x128xi1> to vector<8x128xi1>
    %38 = arith.select %37, %31, %22 : vector<8x128xi1>, vector<8x128xf32>
    %39 = arith.index_cast %26 : i32 to index
    %c0_20 = arith.constant 0 : index
    %40 = vector.load %arg11[%39, %c0_20] : memref<64x128xf32, #tpu.memory_space<vmem>>, vector<8x128xf32>
    tpu.vector_store %arg11[%39, %c0_20], %38 {strides = array<i32>} : memref<64x128xf32, #tpu.memory_space<vmem>>, vector<8x128xf32>,
    %c2_i32 = arith.constant 2 : i32
    %c8_i32_21 = arith.constant 8 : i32
    %41 = arith.muli %c2_i32, %c8_i32_21 : i32
    %42 = tpu.assume_multiple %41, 8 : i32
    %43 = arith.index_cast %42 : i32 to index
    %c0_22 = arith.constant 0 : index
    %44 = vector.load %arg10[%43, %c0_22] : memref<64x128xf32, #tpu.memory_space<vmem>>, vector<8x128xf32>
    %cst_23 = arith.constant dense<0.000000e+00> : vector<8x128xf32>
    %45 = tpu.matmul %38, %7, %cst_23 {dimension_numbers = #tpu.dot_dimension_numbers<[1], [0], [0], [1], [0, 0, 1, 1], [], []>} : vector<8x128xf32>, vector<128x128xf32>, vector<8x128xf32> -> vector<8x128xf32>
    %46 = arith.addf %44, %45 : vector<8x128xf32>
    %47 = math.tanh %46 : vector<8x128xf32>
    %48 = arith.index_cast %c2_i32 : i32 to index
    %c0_24 = arith.constant 0 : index
    %49 = vector.load %arg2[%48, %c0_24] : memref<8x128xf32, #tpu.memory_space<vmem>>, vector<1x128xf32>
    %cst_25 = arith.constant 0.000000e+00 : f32
    %50 = vector.broadcast %cst_25 : f32 to vector<1x128xf32>
    %51 = arith.cmpf one, %49, %50 : vector<1x128xf32>
    %52 = vector.shape_cast %51 : vector<1x128xi1> to vector<1x128xi1>
    %53 = vector.broadcast %52 : vector<1x128xi1> to vector<8x128xi1>
    %54 = arith.select %53, %47, %38 : vector<8x128xi1>, vector<8x128xf32>
    %55 = arith.index_cast %42 : i32 to index
    %c0_26 = arith.constant 0 : index
    %56 = vector.load %arg11[%55, %c0_26] : memref<64x128xf32, #tpu.memory_space<vmem>>, vector<8x128xf32>
    tpu.vector_store %arg11[%55, %c0_26], %54 {strides = array<i32>} : memref<64x128xf32, #tpu.memory_space<vmem>>, vector<8x128xf32>,
    %c3_i32 = arith.constant 3 : i32
    %c8_i32_27 = arith.constant 8 : i32
    %57 = arith.muli %c3_i32, %c8_i32_27 : i32
    %58 = tpu.assume_multiple %57, 8 : i32
    %59 = arith.index_cast %58 : i32 to index
    %c0_28 = arith.constant 0 : index
    %60 = vector.load %arg10[%59, %c0_28] : memref<64x128xf32, #tpu.memory_space<vmem>>, vector<8x128xf32>
    %cst_29 = arith.constant dense<0.000000e+00> : vector<8x128xf32>
    %61 = tpu.matmul %54, %7, %cst_29 {dimension_numbers = #tpu.dot_dimension_numbers<[1], [0], [0], [1], [0, 0, 1, 1], [], []>} : vector<8x128xf32>, vector<128x128xf32>, vector<8x128xf32> -> vector<8x128xf32>
    %62 = arith.addf %60, %61 : vector<8x128xf32>
    %63 = math.tanh %62 : vector<8x128xf32>
    %64 = arith.index_cast %c3_i32 : i32 to index
    %c0_30 = arith.constant 0 : index
    %65 = vector.load %arg2[%64, %c0_30] : memref<8x128xf32, #tpu.memory_space<vmem>>, vector<1x128xf32>
    %cst_31 = arith.constant 0.000000e+00 : f32
    %66 = vector.broadcast %cst_31 : f32 to vector<1x128xf32>
    %67 = arith.cmpf one, %65, %66 : vector<1x128xf32>
    %68 = vector.shape_cast %67 : vector<1x128xi1> to vector<1x128xi1>
    %69 = vector.broadcast %68 : vector<1x128xi1> to vector<8x128xi1>
    %70 = arith.select %69, %63, %54 : vector<8x128xi1>, vector<8x128xf32>
    %71 = arith.index_cast %58 : i32 to index
    %c0_32 = arith.constant 0 : index
    %72 = vector.load %arg11[%71, %c0_32] : memref<64x128xf32, #tpu.memory_space<vmem>>, vector<8x128xf32>
    tpu.vector_store %arg11[%71, %c0_32], %70 {strides = array<i32>} : memref<64x128xf32, #tpu.memory_space<vmem>>, vector<8x128xf32>,
    %c4_i32 = arith.constant 4 : i32
    %c8_i32_33 = arith.constant 8 : i32
    %73 = arith.muli %c4_i32, %c8_i32_33 : i32
    %74 = tpu.assume_multiple %73, 8 : i32
    %75 = arith.index_cast %74 : i32 to index
    %c0_34 = arith.constant 0 : index
    %76 = vector.load %arg10[%75, %c0_34] : memref<64x128xf32, #tpu.memory_space<vmem>>, vector<8x128xf32>
    %cst_35 = arith.constant dense<0.000000e+00> : vector<8x128xf32>
    %77 = tpu.matmul %70, %7, %cst_35 {dimension_numbers = #tpu.dot_dimension_numbers<[1], [0], [0], [1], [0, 0, 1, 1], [], []>} : vector<8x128xf32>, vector<128x128xf32>, vector<8x128xf32> -> vector<8x128xf32>
    %78 = arith.addf %76, %77 : vector<8x128xf32>
    %79 = math.tanh %78 : vector<8x128xf32>
    %80 = arith.index_cast %c4_i32 : i32 to index
    %c0_36 = arith.constant 0 : index
    %81 = vector.load %arg2[%80, %c0_36] : memref<8x128xf32, #tpu.memory_space<vmem>>, vector<1x128xf32>
    %cst_37 = arith.constant 0.000000e+00 : f32
    %82 = vector.broadcast %cst_37 : f32 to vector<1x128xf32>
    %83 = arith.cmpf one, %81, %82 : vector<1x128xf32>
    %84 = vector.shape_cast %83 : vector<1x128xi1> to vector<1x128xi1>
    %85 = vector.broadcast %84 : vector<1x128xi1> to vector<8x128xi1>
    %86 = arith.select %85, %79, %70 : vector<8x128xi1>, vector<8x128xf32>
    %87 = arith.index_cast %74 : i32 to index
    %c0_38 = arith.constant 0 : index
    %88 = vector.load %arg11[%87, %c0_38] : memref<64x128xf32, #tpu.memory_space<vmem>>, vector<8x128xf32>
    tpu.vector_store %arg11[%87, %c0_38], %86 {strides = array<i32>} : memref<64x128xf32, #tpu.memory_space<vmem>>, vector<8x128xf32>,
    %c5_i32 = arith.constant 5 : i32
    %c8_i32_39 = arith.constant 8 : i32
    %89 = arith.muli %c5_i32, %c8_i32_39 : i32
    %90 = tpu.assume_multiple %89, 8 : i32
    %91 = arith.index_cast %90 : i32 to index
    %c0_40 = arith.constant 0 : index
    %92 = vector.load %arg10[%91, %c0_40] : memref<64x128xf32, #tpu.memory_space<vmem>>, vector<8x128xf32>
    %cst_41 = arith.constant dense<0.000000e+00> : vector<8x128xf32>
    %93 = tpu.matmul %86, %7, %cst_41 {dimension_numbers = #tpu.dot_dimension_numbers<[1], [0], [0], [1], [0, 0, 1, 1], [], []>} : vector<8x128xf32>, vector<128x128xf32>, vector<8x128xf32> -> vector<8x128xf32>
    %94 = arith.addf %92, %93 : vector<8x128xf32>
    %95 = math.tanh %94 : vector<8x128xf32>
    %96 = arith.index_cast %c5_i32 : i32 to index
    %c0_42 = arith.constant 0 : index
    %97 = vector.load %arg2[%96, %c0_42] : memref<8x128xf32, #tpu.memory_space<vmem>>, vector<1x128xf32>
    %cst_43 = arith.constant 0.000000e+00 : f32
    %98 = vector.broadcast %cst_43 : f32 to vector<1x128xf32>
    %99 = arith.cmpf one, %97, %98 : vector<1x128xf32>
    %100 = vector.shape_cast %99 : vector<1x128xi1> to vector<1x128xi1>
    %101 = vector.broadcast %100 : vector<1x128xi1> to vector<8x128xi1>
    %102 = arith.select %101, %95, %86 : vector<8x128xi1>, vector<8x128xf32>
    %103 = arith.index_cast %90 : i32 to index
    %c0_44 = arith.constant 0 : index
    %104 = vector.load %arg11[%103, %c0_44] : memref<64x128xf32, #tpu.memory_space<vmem>>, vector<8x128xf32>
    tpu.vector_store %arg11[%103, %c0_44], %102 {strides = array<i32>} : memref<64x128xf32, #tpu.memory_space<vmem>>, vector<8x128xf32>,
    %c6_i32 = arith.constant 6 : i32
    %c8_i32_45 = arith.constant 8 : i32
    %105 = arith.muli %c6_i32, %c8_i32_45 : i32
    %106 = tpu.assume_multiple %105, 8 : i32
    %107 = arith.index_cast %106 : i32 to index
    %c0_46 = arith.constant 0 : index
    %108 = vector.load %arg10[%107, %c0_46] : memref<64x128xf32, #tpu.memory_space<vmem>>, vector<8x128xf32>
    %cst_47 = arith.constant dense<0.000000e+00> : vector<8x128xf32>
    %109 = tpu.matmul %102, %7, %cst_47 {dimension_numbers = #tpu.dot_dimension_numbers<[1], [0], [0], [1], [0, 0, 1, 1], [], []>} : vector<8x128xf32>, vector<128x128xf32>, vector<8x128xf32> -> vector<8x128xf32>
    %110 = arith.addf %108, %109 : vector<8x128xf32>
    %111 = math.tanh %110 : vector<8x128xf32>
    %112 = arith.index_cast %c6_i32 : i32 to index
    %c0_48 = arith.constant 0 : index
    %113 = vector.load %arg2[%112, %c0_48] : memref<8x128xf32, #tpu.memory_space<vmem>>, vector<1x128xf32>
    %cst_49 = arith.constant 0.000000e+00 : f32
    %114 = vector.broadcast %cst_49 : f32 to vector<1x128xf32>
    %115 = arith.cmpf one, %113, %114 : vector<1x128xf32>
    %116 = vector.shape_cast %115 : vector<1x128xi1> to vector<1x128xi1>
    %117 = vector.broadcast %116 : vector<1x128xi1> to vector<8x128xi1>
    %118 = arith.select %117, %111, %102 : vector<8x128xi1>, vector<8x128xf32>
    %119 = arith.index_cast %106 : i32 to index
    %c0_50 = arith.constant 0 : index
    %120 = vector.load %arg11[%119, %c0_50] : memref<64x128xf32, #tpu.memory_space<vmem>>, vector<8x128xf32>
    tpu.vector_store %arg11[%119, %c0_50], %118 {strides = array<i32>} : memref<64x128xf32, #tpu.memory_space<vmem>>, vector<8x128xf32>,
    %c7_i32 = arith.constant 7 : i32
    %c8_i32_51 = arith.constant 8 : i32
    %121 = arith.muli %c7_i32, %c8_i32_51 : i32
    %122 = tpu.assume_multiple %121, 8 : i32
    %123 = arith.index_cast %122 : i32 to index
    %c0_52 = arith.constant 0 : index
    %124 = vector.load %arg10[%123, %c0_52] : memref<64x128xf32, #tpu.memory_space<vmem>>, vector<8x128xf32>
    %cst_53 = arith.constant dense<0.000000e+00> : vector<8x128xf32>
    %125 = tpu.matmul %118, %7, %cst_53 {dimension_numbers = #tpu.dot_dimension_numbers<[1], [0], [0], [1], [0, 0, 1, 1], [], []>} : vector<8x128xf32>, vector<128x128xf32>, vector<8x128xf32> -> vector<8x128xf32>
    %126 = arith.addf %124, %125 : vector<8x128xf32>
    %127 = math.tanh %126 : vector<8x128xf32>
    %128 = arith.index_cast %c7_i32 : i32 to index
    %c0_54 = arith.constant 0 : index
    %129 = vector.load %arg2[%128, %c0_54] : memref<8x128xf32, #tpu.memory_space<vmem>>, vector<1x128xf32>
    %cst_55 = arith.constant 0.000000e+00 : f32
    %130 = vector.broadcast %cst_55 : f32 to vector<1x128xf32>
    %131 = arith.cmpf one, %129, %130 : vector<1x128xf32>
    %132 = vector.shape_cast %131 : vector<1x128xi1> to vector<1x128xi1>
    %133 = vector.broadcast %132 : vector<1x128xi1> to vector<8x128xi1>
    %134 = arith.select %133, %127, %118 : vector<8x128xi1>, vector<8x128xf32>
    %135 = arith.index_cast %122 : i32 to index
    %c0_56 = arith.constant 0 : index
    %136 = vector.load %arg11[%135, %c0_56] : memref<64x128xf32, #tpu.memory_space<vmem>>, vector<8x128xf32>
    tpu.vector_store %arg11[%135, %c0_56], %134 {strides = array<i32>} : memref<64x128xf32, #tpu.memory_space<vmem>>, vector<8x128xf32>,
    %c8_i32_57 = arith.constant 8 : i32
    %c0_58 = arith.constant 0 : index
    %c0_59 = arith.constant 0 : index
    %137 = vector.load %arg9[%c0_58, %c0_59] : memref<8x128xf32, #tpu.memory_space<vmem>>, vector<8x128xf32>
    tpu.vector_store %arg9[%c0_58, %c0_59], %134 {strides = array<i32>} : memref<8x128xf32, #tpu.memory_space<vmem>>, vector<8x128xf32>,
    %c0_60 = arith.constant 0 : index
    %c0_61 = arith.constant 0 : index
    %138 = vector.load %arg11[%c0_60, %c0_61] : memref<64x128xf32, #tpu.memory_space<vmem>>, vector<64x128xf32>
    %c0_62 = arith.constant 0 : index
    %c0_63 = arith.constant 0 : index
    %139 = vector.load %arg6[%c0_62, %c0_63] : memref<128x128xf32, #tpu.memory_space<vmem>>, vector<128x128xf32>
    %cst_64 = arith.constant dense<0.000000e+00> : vector<64x128xf32>
    %140 = tpu.matmul %138, %139, %cst_64 {dimension_numbers = #tpu.dot_dimension_numbers<[1], [0], [0], [1], [0, 0, 1, 1], [], []>} : vector<64x128xf32>, vector<128x128xf32>, vector<64x128xf32> -> vector<64x128xf32>
    %c0_65 = arith.constant 0 : index
    %c0_66 = arith.constant 0 : index
    %141 = vector.load %arg7[%c0_65, %c0_66] : memref<1x128xf32, #tpu.memory_space<vmem>>, vector<1x128xf32>
    %142 = vector.broadcast %141 : vector<1x128xf32> to vector<64x128xf32>
    %143 = arith.addf %140, %142 : vector<64x128xf32>
    %144 = math.tanh %143 : vector<64x128xf32>
    %c0_67 = arith.constant 0 : index
    %c0_68 = arith.constant 0 : index
    %145 = vector.load %arg8[%c0_67, %c0_68] : memref<64x128xf32, #tpu.memory_space<vmem>>, vector<64x128xf32>
    tpu.vector_store %arg8[%c0_67, %c0_68], %144 {strides = array<i32>} : memref<64x128xf32, #tpu.memory_space<vmem>>, vector<64x128xf32>,
    return
  }
  func.func @transform_0(%arg0: i32) -> (i32, i32) {
    %c0_i32 = arith.constant 0 : i32
    %c0_i32_0 = arith.constant 0 : i32
    %c0_i32_1 = arith.constant 0 : i32
    return %c0_i32, %c0_i32_0 : i32, i32
  }
  func.func @transform_1(%arg0: i32) -> (i32, i32) {
    %c0_i32 = arith.constant 0 : i32
    %c0_i32_0 = arith.constant 0 : i32
    %c0_i32_1 = arith.constant 0 : i32
    return %c0_i32, %c0_i32_0 : i32, i32
  }
  func.func @transform_2(%arg0: i32) -> (i32, i32) {
    %c0_i32 = arith.constant 0 : i32
    %c0_i32_0 = arith.constant 0 : i32
    %c0_i32_1 = arith.constant 0 : i32
    return %c0_i32, %c0_i32_0 : i32, i32
  }
  func.func @transform_3(%arg0: i32) -> (i32, i32) {
    %c0_i32 = arith.constant 0 : i32
    %c0_i32_0 = arith.constant 0 : i32
    %c0_i32_1 = arith.constant 0 : i32
    return %c0_i32, %c0_i32_0 : i32, i32
  }
  func.func @transform_4(%arg0: i32) -> (i32, i32) {
    %c0_i32 = arith.constant 0 : i32
    %c0_i32_0 = arith.constant 0 : i32
    %c0_i32_1 = arith.constant 0 : i32
    return %c0_i32, %c0_i32_0 : i32, i32
  }
  func.func @transform_5(%arg0: i32) -> (i32, i32) {
    %c0_i32 = arith.constant 0 : i32
    %c0_i32_0 = arith.constant 0 : i32
    %c0_i32_1 = arith.constant 0 : i32
    return %c0_i32, %c0_i32_0 : i32, i32
  }
  func.func @transform_6(%arg0: i32) -> (i32, i32) {
    %c0_i32 = arith.constant 0 : i32
    %c0_i32_0 = arith.constant 0 : i32
    %c0_i32_1 = arith.constant 0 : i32
    return %c0_i32, %c0_i32_0 : i32, i32
  }
  func.func @transform_7(%arg0: i32) -> (i32, i32) {
    %c0_i32 = arith.constant 0 : i32
    %c0_i32_0 = arith.constant 0 : i32
    %c0_i32_1 = arith.constant 0 : i32
    return %c0_i32, %c0_i32_0 : i32, i32
  }
  func.func @transform_8(%arg0: i32) -> (i32, i32) {
    %c0_i32 = arith.constant 0 : i32
    %c0_i32_0 = arith.constant 0 : i32
    %c0_i32_1 = arith.constant 0 : i32
    return %c0_i32, %c0_i32_0 : i32, i32
  }
}

</mosaic_0001>

<bundles_post_ra>
// kernel: tpu_custom_call.1
= control target key start
LH: loop header
LB: loop body
LE: loop exit
PB: predicated region body
PF: predicated region fallthrough
CT: control target
= control target key end

     0   :  { %14 = vsyncpa [#allocation5], 0  ;;  %s2553_s0 = inlined_call_operand.hbm [shape: f32[64,128], index: 0, kind: input, shape index: {}]   ;;  %s2554_s1 = inlined_call_operand.hbm [shape: f32[8,128], index: 1, kind: input, shape index: {}]   ;;  %s2555_s2 = inlined_call_operand.hbm [shape: f32[128,128], index: 2, kind: input, shape index: {}]   ;;  %s2556_s3 = inlined_call_operand.hbm [shape: f32[128,128], index: 3, kind: input, shape index: {}]   ;;  %s2557_s4 = inlined_call_operand.vmem [shape: f32[1,128], index: 4, kind: input, shape index: {}]   ;;  %s2558_s5 = inlined_call_operand.hbm [shape: f32[128,128], index: 5, kind: input, shape index: {}]   ;;  %s2559_s6 = inlined_call_operand.vmem [shape: f32[1,128], index: 6, kind: input, shape index: {}]   ;;  %s2560_s7 = inlined_call_operand.hbm [shape: f32[64,128], index: 7, kind: output, shape index: {0}]   ;;  %s2561_s8 = inlined_call_operand.hbm [shape: f32[8,128], index: 8, kind: output, shape index: {1}]  }
   0x1   :  { %15 = vsyncpa [#allocation8], 0 }
   0x2   :  { %16 = vsyncpa [#allocation11], 0 }
   0x3   :  { %17 = vsyncpa [#allocation6], 0 }
   0x4   :  { %18 = vsyncpa [#allocation15], 0  ;;  %s2141_s27 = smov [#allocation7]   ;;  %s1977_s9 = scalar_lea.hbm %s2554_s1, 128 }
   0x5   :  { %s37_s28 = sshll.u32 %s2141_s27, 4  ;;  %p1978_p0 = scmp.ne.s32.totalorder %s2554_s1, %s1977_s9  ;;  %s38_s28 = int_to_ptr.vmem [resolvable:$true] %s37_s28 }
   0x6   :  { %p1981_p1 = scmp.lt.u32.totalorder %s1977_s9, %s2554_s1 }
   0x8   :  { %p1983_p2 = pnand %p1981_p1, %p1978_p0 }
   0xa   :  { %1986 = shalt.err (!%p1983_p2)
}
   0xb   :  { %s1987_s14 = scalar_lea.vmem %s38_s28, 128  ;;  %p1992_p4 = scmp.lt.s32.totalorder %s38_s28, %s38_s28 }
   0xc   :  { %p1988_p3 = scmp.ne.s32.totalorder %s38_s28, %s1987_s14  ;;  %p1993_p5 = scmp.lt.s32.totalorder %s1987_s14, %s1987_s14 }
   0xe   :  { %p1994_p6 = por %p1993_p5, %p1992_p4 }
  0x10   :  { %p1995_p7 = pnand %p1994_p6, %p1988_p3 }
  0x12   :  { %1998 = shalt.err (!%p1995_p7)
}
  0x13   :  { %40 = dma.hbm_to_vmem [thread:$0]  %s2554_s1, 128, %s38_s28, [#allocation8]  }
  0x14   :  { %s2142_s17 = smov [#allocation10]   ;;  %s2143_s19 = smov [#allocation4]  }
  0x15   :  { %s58_s18 = sshll.u32 %s2142_s17, 4  ;;  %s24_s20 = sshll.u32 %s2143_s19, 4  ;;  %s59_s18 = int_to_ptr.vmem [resolvable:$true] %s58_s18  ;;  %s25_s20 = int_to_ptr.vmem [resolvable:$true] %s24_s20 }
  0x16   :  { %s1999_s23 = scalar_lea.hbm %s2556_s3, 2048 }
  0x17   :  { %p2000_p8 = scmp.ne.s32.totalorder %s2556_s3, %s1999_s23  ;;  %p2003_p9 = scmp.lt.u32.totalorder %s1999_s23, %s2556_s3 }
  0x19   :  { %p2005_p10 = pnand %p2003_p9, %p2000_p8 }
  0x1b   :  { %2008 = shalt.err (!%p2005_p10)
}
  0x1c   :  { %s2009_s1 = scalar_lea.vmem %s59_s18, 2048  ;;  %p2014_p12 = scmp.lt.s32.totalorder %s59_s18, %s59_s18 }
  0x1d   :  { %p2010_p11 = scmp.ne.s32.totalorder %s59_s18, %s2009_s1  ;;  %p2015_p13 = scmp.lt.s32.totalorder %s2009_s1, %s2009_s1 }
  0x1f   :  { %p2016_p0 = por %p2015_p13, %p2014_p12 }
  0x21   :  { %p2017_p1 = pnand %p2016_p0, %p2010_p11 }
  0x23   :  { %2020 = shalt.err (!%p2017_p1)
}
  0x24   :  { %s2144_s28 = smov 128   ;;  %s2145_s29 = smov 8  }
  0x25   :  { %64 = dma.hbm_to_vmem [thread:$0]  %s2556_s3, 2048, %s59_s18, [#allocation11], %s2144_s28, %s2144_s28, %s2145_s29  }
  0x26   :  { %s2021_s12 = scalar_lea.hbm %s2553_s0, 1024 }
  0x27   :  { %p2022_p2 = scmp.ne.s32.totalorder %s2553_s0, %s2021_s12  ;;  %p2025_p3 = scmp.lt.u32.totalorder %s2021_s12, %s2553_s0 }
  0x29   :  { %p2027_p4 = pnand %p2025_p3, %p2022_p2 }
  0x2b   :  { %2030 = shalt.err (!%p2027_p4)
}
  0x2c   :  { %s2031_s17 = scalar_lea.vmem %s25_s20, 1024  ;;  %p2036_p6 = scmp.lt.s32.totalorder %s25_s20, %s25_s20 }
  0x2d   :  { %p2032_p5 = scmp.ne.s32.totalorder %s25_s20, %s2031_s17  ;;  %p2037_p7 = scmp.lt.s32.totalorder %s2031_s17, %s2031_s17 }
  0x2f   :  { %p2038_p8 = por %p2037_p7, %p2036_p6 }
  0x31   :  { %p2039_p9 = pnand %p2038_p8, %p2032_p5 }
  0x33   :  { %2042 = shalt.err (!%p2039_p9)
}
  0x34   :  { %30 = dma.hbm_to_vmem [thread:$0]  %s2553_s0, 1024, %s25_s20, [#allocation5], %s2144_s28, %s2144_s28, %s2145_s29  }
  0x35   :  { %s2146_s19 = smov [#allocation9]   ;;  %s2147_s22 = smov [#allocation12]  }
  0x36   :  { %s46_s21 = sshll.u32 %s2146_s19, 4  ;;  %s72_s23 = sshll.u32 %s2147_s22, 4  ;;  %s47_s21 = int_to_ptr.vmem [resolvable:$true] %s46_s21  ;;  %s73_s23 = int_to_ptr.vmem [resolvable:$true] %s72_s23 }
  0x37   :  { %s2043_s26 = scalar_lea.hbm %s2555_s2, 2048 }
  0x38   :  { %p2044_p10 = scmp.ne.s32.totalorder %s2555_s2, %s2043_s26  ;;  %p2047_p11 = scmp.lt.u32.totalorder %s2043_s26, %s2555_s2 }
  0x3a   :  { %p2049_p12 = pnand %p2047_p11, %p2044_p10 }
  0x3c   :  { %2052 = shalt.err (!%p2049_p12)
}
  0x3d   :  { %s2053_s0 = scalar_lea.vmem %s47_s21, 2048  ;;  %p2058_p0 = scmp.lt.s32.totalorder %s47_s21, %s47_s21 }
  0x3e   :  { %p2054_p13 = scmp.ne.s32.totalorder %s47_s21, %s2053_s0  ;;  %p2059_p1 = scmp.lt.s32.totalorder %s2053_s0, %s2053_s0 }
  0x40   :  { %p2060_p2 = por %p2059_p1, %p2058_p0 }
  0x42   :  { %p2061_p3 = pnand %p2060_p2, %p2054_p13 }
  0x44   :  { %2064 = shalt.err (!%p2061_p3)
}
  0x45   :  { %52 = dma.hbm_to_vmem [thread:$0]  %s2555_s2, 2048, %s47_s21, [#allocation8], %s2144_s28, %s2144_s28, %s2145_s29  }
  0x46   :  { %s2065_s13 = scalar_lea.hbm %s2558_s5, 2048 }
  0x47   :  { %p2066_p4 = scmp.ne.s32.totalorder %s2558_s5, %s2065_s13  ;;  %p2069_p5 = scmp.lt.u32.totalorder %s2065_s13, %s2558_s5 }
  0x49   :  { %p2071_p6 = pnand %p2069_p5, %p2066_p4 }
  0x4b   :  { %2074 = shalt.err (!%p2071_p6)
}
  0x4c   :  { %s2075_s3 = scalar_lea.vmem %s73_s23, 2048  ;;  %p2080_p8 = scmp.lt.s32.totalorder %s73_s23, %s73_s23 }
  0x4d   :  { %p2076_p7 = scmp.ne.s32.totalorder %s73_s23, %s2075_s3  ;;  %p2081_p9 = scmp.lt.s32.totalorder %s2075_s3, %s2075_s3 }
  0x4f   :  { %p2082_p10 = por %p2081_p9, %p2080_p8 }
  0x51   :  { %p2083_p11 = pnand %p2082_p10, %p2076_p7 }
  0x53   :  { %2086 = shalt.err (!%p2083_p11)
}
  0x54   :  { %78 = dma.hbm_to_vmem [thread:$0]  %s2558_s5, 2048, %s73_s23, [#allocation11], %s2144_s28, %s2144_s28, %s2145_s29  }
  0x55   :  { %2131 = dma.done.wait [#allocation5], 1024  }
  0x56   :  { %2132 = vsyncadd [#allocation5], 4294966272 }
  0x57   :  { %2133 = dma.done.wait [#allocation8], 2176  }
  0x58   :  { %2134 = vsyncadd [#allocation8], 4294965120 }
  0x59   :  { %2135 = dma.done.wait [#allocation11], 4096  }
  0x5a   :  { %2136 = vsyncadd [#allocation11], 4294963200  ;;  %v2148_v0 = vmov 0.0|0.0   ;;  %vm2149_vm0 = vmmov 0   ;;  %v2150_v1 = vmov 0.0   ;;  %v104_v2 = vld [vmem:[#allocation9] sm:$0xff]  ;;  %v332_v58 = vlaneseq }
  0x5b   :  { %1708 = vmatprep.subr.bf16.mxu1 %v2148_v0  ;;  %1384 = vmatprep.mubr.msk.f32.mxu1 %vm2149_vm0, %v2150_v1  ;;  %v105_v3 = vld [vmem:[#allocation9 + $0x8] sm:$0xff]  ;;  %v240_v4 = vld [vmem:[#allocation10] sm:$0xff]  ;;  %v106_v7 = vld [vmem:[#allocation9 + $0x10] sm:$0xff] }
  0x5c   :  { %v1676_v5 = vpack.c.bf16 %v105_v3, %v104_v2  ;;  %v241_v6 = vld [vmem:[#allocation10 + $0x8] sm:$0xff]  ;;  %v107_v8 = vld [vmem:[#allocation9 + $0x18] sm:$0xff]  ;;  %v242_v11 = vld [vmem:[#allocation10 + $0x10] sm:$0xff] }
  0x5d   :  { %v2274_v9 = vpack.c.bf16 %v241_v6, %v240_v4  ;;  %v1680_v10 = vpack.c.bf16 %v107_v8, %v106_v7  ;;  %v243_v12 = vld [vmem:[#allocation10 + $0x18] sm:$0xff]  ;;  %v108_v13 = vld [vmem:[#allocation9 + $0x20] sm:$0xff]  ;;  %v109_v14 = vld [vmem:[#allocation9 + $0x28] sm:$0xff]  ;;  %v333_v4 = vshrl.u32 %v332_v58, 7  ;;  %v2151_v7 = vmov 0  }
  0x5e   :  { %1677 = vmatprep.subr.bf16.mxu0 %v1676_v5  ;;  %v2277_v15 = vpack.c.bf16 %v243_v12, %v242_v11  ;;  %v1684_v16 = vpack.c.bf16 %v109_v14, %v108_v13  ;;  %v244_v17 = vld [vmem:[#allocation10 + $0x20] sm:$0xff]  ;;  %v245_v18 = vld [vmem:[#allocation10 + $0x28] sm:$0xff]  ;;  %v110_v19 = vld [vmem:[#allocation9 + $0x30] sm:$0xff] }
  0x5f   :  { %1679 = vmatpush3.bf16.msra.mxu0 %v1676_v5  ;;  %1710 = vmatpush3.bf16.msra.mxu1 %v2274_v9  ;;  %v111_v20 = vld [vmem:[#allocation9 + $0x38] sm:$0xff]  ;;  %v2281_v21 = vpack.c.bf16 %v245_v18, %v244_v17  ;;  %v246_v23 = vld [vmem:[#allocation10 + $0x30] sm:$0xff]  ;;  %v112_v25 = vld [vmem:[#allocation9 + $0x40] sm:$0xff]  ;;  %v2350_v6 = vsub.s32 0, %v333_v4 }
  0x60   :  { %1681 = vmatprep.subr.bf16.mxu0 %v1680_v10  ;;  %1711 = vmatprep.subr.bf16.mxu1 %v2148_v0  ;;  %v1688_v22 = vpack.c.bf16 %v111_v20, %v110_v19  ;;  %v247_v24 = vld [vmem:[#allocation10 + $0x38] sm:$0xff]  ;;  %v113_v26 = vld [vmem:[#allocation9 + $0x48] sm:$0xff]  ;;  %v248_v30 = vld [vmem:[#allocation10 + $0x40] sm:$0xff] }
  0x61   :  { %v96_v27 = vld [vmem:[#allocation4] sm:$0xff]  ;;  %v2285_v28 = vpack.c.bf16 %v247_v24, %v246_v23  ;;  %v1692_v29 = vpack.c.bf16 %v113_v26, %v112_v25  ;;  %v249_v31 = vld [vmem:[#allocation10 + $0x48] sm:$0xff]  ;;  %v114_v32 = vld [vmem:[#allocation9 + $0x50] sm:$0xff] }
  0x62   :  { %1340 = vmatprep.mubr.f32.mxu0 %v96_v27  ;;  %v115_v33 = vld [vmem:[#allocation9 + $0x58] sm:$0xff]  ;;  %v2289_v34 = vpack.c.bf16 %v249_v31, %v248_v30  ;;  %v250_v36 = vld [vmem:[#allocation10 + $0x50] sm:$0xff]  ;;  %v116_v38 = vld [vmem:[#allocation9 + $0x60] sm:$0xff] }
  0x63   :  { %1683 = vmatpush3.bf16.msra.mxu0 %v1680_v10  ;;  %1713 = vmatpush3.bf16.msra.mxu1 %v2277_v15  ;;  %v1696_v35 = vpack.c.bf16 %v115_v33, %v114_v32  ;;  %v251_v37 = vld [vmem:[#allocation10 + $0x58] sm:$0xff]  ;;  %v117_v39 = vld [vmem:[#allocation9 + $0x68] sm:$0xff]  ;;  %v252_v42 = vld [vmem:[#allocation10 + $0x60] sm:$0xff] }
  0x64   :  { %1685 = vmatprep.subr.bf16.mxu0 %v1684_v16  ;;  %1714 = vmatprep.subr.bf16.mxu1 %v2148_v0  ;;  %v2293_v40 = vpack.c.bf16 %v251_v37, %v250_v36  ;;  %v1700_v41 = vpack.c.bf16 %v117_v39, %v116_v38  ;;  %v253_v43 = vld [vmem:[#allocation10 + $0x68] sm:$0xff]  ;;  %v118_v44 = vld [vmem:[#allocation9 + $0x70] sm:$0xff]  ;;  %v119_v45 = vld [vmem:[#allocation9 + $0x78] sm:$0xff] }
  0x65   :  { %v2297_v46 = vpack.c.bf16 %v253_v43, %v252_v42  ;;  %v1704_v47 = vpack.c.bf16 %v119_v45, %v118_v44  ;;  %v254_v48 = vld [vmem:[#allocation10 + $0x70] sm:$0xff]  ;;  %v255_v49 = vld [vmem:[#allocation10 + $0x78] sm:$0xff]  ;;  %v97_v51 = vld [vmem:[#allocation4 + $0x8] sm:$0xff] }
  0x66   :  { %v2301_v50 = vpack.c.bf16 %v255_v49, %v254_v48  ;;  %v98_v52 = vld [vmem:[#allocation4 + $0x10] sm:$0xff]  ;;  %v99_v53 = vld [vmem:[#allocation4 + $0x18] sm:$0xff]  ;;  %v100_v54 = vld [vmem:[#allocation4 + $0x20] sm:$0xff] }
  0x67   :  { %1687 = vmatpush3.bf16.msra.mxu0 %v1684_v16  ;;  %1716 = vmatpush3.bf16.msra.mxu1 %v2281_v21  ;;  %v101_v55 = vld [vmem:[#allocation4 + $0x28] sm:$0xff]  ;;  %v102_v56 = vld [vmem:[#allocation4 + $0x30] sm:$0xff]  ;;  %v103_v57 = vld [vmem:[#allocation4 + $0x38] sm:$0xff] }
  0x68   :  { %1689 = vmatprep.subr.bf16.mxu0 %v1688_v22  ;;  %1717 = vmatprep.subr.bf16.mxu1 %v2148_v0  ;;  %v2347_v59 = vld [vmem:[%s2557_s4] ss:$0 sm:$0xff]  ;;  %v413_v20 = vld [vmem:[#allocation7 + $0x1] sm:$0x1]  ;;  %v498_v32 = vld [vmem:[#allocation7 + $0x2] sm:$0x1] }
  0x69   :  { %v329_v2 = vld [vmem:[#allocation7] sm:$0x1]  ;;  %vm414_vm3 = vcmp.ne.f32.partialorder %v413_v20, 0.0  ;;  %vm499_vm5 = vcmp.ne.f32.partialorder %v498_v32, 0.0  ;;  %v583_v43 = vld [vmem:[#allocation7 + $0x3] sm:$0x1] }
  0x6a   :  { %vm330_vm1 = vcmp.ne.f32.partialorder %v329_v2, 0.0  ;;  %v415_v26 = vsel %vm414_vm3, 1, %v2151_v7  ;;  %v500_v38 = vsel %vm499_vm5, 1, %v2151_v7  ;;  %vm584_vm7 = vcmp.ne.f32.partialorder %v583_v43, 0.0  ;;  %v946_v4 = vld [vmem:[#allocation12 + $0x18] sm:$0xff]  ;;  %v956_v11 = vld [vmem:[#allocation12 + $0x68] sm:$0xff] }
  0x6b   :  { %1691 = vmatpush3.bf16.msra.mxu0 %v1688_v22  ;;  %1719 = vmatpush3.bf16.msra.mxu1 %v2285_v28  ;;  %v331_v8 = vsel %vm330_vm1, 1, %v2151_v7  ;;  %v419_v27 = vrot.slane %v415_v26, %v2350_v6  ;;  %v504_v39 = vrot.slane %v500_v38, %v2350_v6  ;;  %v585_v49 = vsel %vm584_vm7, 1, %v2151_v7  ;;  %v954_v26 = vld [vmem:[#allocation12 + $0x58] sm:$0xff] }
  0x6c   :  { %1693 = vmatprep.subr.bf16.mxu0 %v1692_v29  ;;  %1720 = vmatprep.subr.bf16.mxu1 %v2148_v0  ;;  %v335_v10 = vrot.slane %v331_v8, %v2350_v6  ;;  %v958_v32 = vld [vmem:[#allocation12 + $0x78] sm:$0xff] }
  0x6d   :  { %vm420_vm4 = vcmp.eq.s32.totalorder %v419_v27, 1  ;;  %vm505_vm6 = vcmp.eq.s32.totalorder %v504_v39, 1 }
  0x6e   :  { %vm2354_vm2 = vcmp.eq.s32.totalorder %v335_v10, 1  ;;  %v947_v10 = vld [vmem:[#allocation12 + $0x20] sm:$0xff] }
  0x6f   :  { %1695 = vmatpush3.bf16.msra.mxu0 %v1692_v29  ;;  %1722 = vmatpush3.bf16.msra.mxu1 %v2289_v34 }
  0x70   :  { %1697 = vmatprep.subr.bf16.mxu0 %v1696_v35  ;;  %1723 = vmatprep.subr.bf16.mxu1 %v2148_v0 }
  0x73   :  { %1699 = vmatpush3.bf16.msra.mxu0 %v1696_v35  ;;  %1725 = vmatpush3.bf16.msra.mxu1 %v2293_v40 }
  0x74   :  { %1701 = vmatprep.subr.bf16.mxu0 %v1700_v41  ;;  %1726 = vmatprep.subr.bf16.mxu1 %v2148_v0 }
  0x77   :  { %1703 = vmatpush3.bf16.msra.mxu0 %v1700_v41  ;;  %1728 = vmatpush3.bf16.msra.mxu1 %v2297_v46 }
  0x78   :  { %1705 = vmatprep.subr.bf16.mxu0 %v1704_v47  ;;  %1729 = vmatprep.subr.bf16.mxu1 %v2148_v0 }
  0x7b   :  { %1707 = vmatpush3.bf16.msra.mxu0 %v1704_v47  ;;  %1731 = vmatpush3.bf16.msra.mxu1 %v2301_v50 }
  0x7c   :  { %1732 = vmatprep.subr.bf16.mxu0 %v2148_v0  ;;  %1756 = vmatprep.subr.bf16.mxu1 %v2148_v0 }
  0x7e   :  { %1341 = vmatmul.mubr.f32.vlgmr.msra.gmra.mrb[0].mxu0 %v97_v51  ;;  %1385 = vmatmul.mubr.f32.vlgmr.msra.gmra.mrb[0].mxu1 %v2150_v1  ;;  %v589_v51 = vrot.slane %v585_v49, %v2350_v6 }
  0x7f   :  { %1734 = vmatpush3.bf16.msra.mxu0 %v2274_v9  ;;  %1758 = vmatpush3.bf16.msra.mxu1 %v2274_v9 }
  0x80   :  { %1735 = vmatprep.subr.bf16.mxu0 %v2148_v0  ;;  %1759 = vmatprep.subr.bf16.mxu1 %v2148_v0  ;;  %vm590_vm8 = vcmp.eq.s32.totalorder %v589_v51, 1 }
  0x81   :  { %1454 = vmatprep.mubr.msk.f32.mxu1 %vm2149_vm0, %v2150_v1  ;;  %1343 = vmatprep.mubr.f32.mxu0 %v98_v52 }
  0x82   :  { %1344 = vmatmul.mubr.f32.gmra.mrb[2].mxu0 %v99_v53 }
  0x83   :  { %1737 = vmatpush3.bf16.msra.mxu0 %v2277_v15  ;;  %1761 = vmatpush3.bf16.msra.mxu1 %v2277_v15 }
  0x84   :  { %1738 = vmatprep.subr.bf16.mxu0 %v2148_v0  ;;  %1762 = vmatprep.subr.bf16.mxu1 %v2148_v0 }
  0x85   :  { %1346 = vmatprep.mubr.f32.mxu0 %v100_v54  ;;  %v668_v54 = vld [vmem:[#allocation7 + $0x4] sm:$0x1] }
  0x86   :  { %1347 = vmatmul.mubr.f32.gmra.mrb[4].mxu0 %v101_v55  ;;  %vm669_vm9 = vcmp.ne.f32.partialorder %v668_v54, 0.0 }
  0x87   :  { %1740 = vmatpush3.bf16.msra.mxu0 %v2281_v21  ;;  %1764 = vmatpush3.bf16.msra.mxu1 %v2281_v21 }
  0x88   :  { %1741 = vmatprep.subr.bf16.mxu0 %v2148_v0  ;;  %1765 = vmatprep.subr.bf16.mxu1 %v2148_v0 }
  0x89   :  { %1349 = vmatprep.mubr.f32.mxu0 %v102_v56 }
  0x8a   :  { %1350 = vmatmul.mubr.f32.gmra.mrb[6].mxu0 %v103_v57 }
  0x8b   :  { %1743 = vmatpush3.bf16.msra.mxu0 %v2285_v28  ;;  %1767 = vmatpush3.bf16.msra.mxu1 %v2285_v28 }
  0x8c   :  { %1744 = vmatprep.subr.bf16.mxu0 %v2148_v0  ;;  %1768 = vmatprep.subr.bf16.mxu1 %v2148_v0 }
  0x8d   :  { %1419 = vmatprep.mubr.msk.f32.mxu0 %vm2149_vm0, %v2150_v1 }
  0x8f   :  { %1746 = vmatpush3.bf16.msra.mxu0 %v2289_v34  ;;  %1770 = vmatpush3.bf16.msra.mxu1 %v2289_v34 }
  0x90   :  { %1747 = vmatprep.subr.bf16.mxu0 %v2148_v0  ;;  %1771 = vmatprep.subr.bf16.mxu1 %v2148_v0 }
  0x93   :  { %1749 = vmatpush3.bf16.msra.mxu0 %v2293_v40  ;;  %1773 = vmatpush3.bf16.msra.mxu1 %v2293_v40 }
  0x94   :  { %1750 = vmatprep.subr.bf16.mxu0 %v2148_v0  ;;  %1774 = vmatprep.subr.bf16.mxu1 %v2148_v0 }
  0x97   :  { %1752 = vmatpush3.bf16.msra.mxu0 %v2297_v46  ;;  %1776 = vmatpush3.bf16.msra.mxu1 %v2297_v46 }
  0x98   :  { %1753 = vmatprep.subr.bf16.mxu0 %v2148_v0  ;;  %1777 = vmatprep.subr.bf16.mxu1 %v2148_v0 }
  0x9b   :  { %1755 = vmatpush3.bf16.msra.mxu0 %v2301_v50  ;;  %1779 = vmatpush3.bf16.msra.mxu1 %v2301_v50 }
  0x9c   :  { %1780 = vmatprep.subr.bf16.mxu0 %v2148_v0  ;;  %1804 = vmatprep.subr.bf16.mxu1 %v2148_v0 }
 0x151   :  { %v1342_v60 = vpop.f32.mrb[0].mxu0  ;;  %v323_v61 = vpop.f32.mrb[0].mxu1 }
 0x152   :  { %v193_v62 = vpop.f32.mrb[1].mxu0  ;;  %v1386_v63 = vpop.f32.mrb[1].mxu1  ;;  %v199_v22 = vadd.f32 %v1342_v60, %v2347_v59  ;;  %v670_v60 = vsel %vm669_vm9, 1, %v2151_v7 }
 0x153   :  { %v194_v3 = vadd.f32 %v2347_v59, %v193_v62 }
 0x155   :  { %v327_v5 = vadd.f32 %v323_v61, %v194_v3  ;;  %v2381_v13 = vpop.f32.mrb[2].mxu0  ;;  %v674_v61 = vrot.slane %v670_v60, %v2350_v6 }
 0x156   :  { %v203_v14 = vpop.f32.mrb[3].mxu0  ;;  %v209_v44 = vadd.f32 %v2381_v13, %v2347_v59  ;;  %v948_v13 = vld [vmem:[#allocation12 + $0x28] sm:$0xff] }
 0x157   :  { %1945 = vtanh.f32 %v327_v5  ;;  %v204_v33 = vadd.f32 %v2347_v59, %v203_v14  ;;  %vm675_vm10 = vcmp.eq.s32.totalorder %v674_v61, 1  ;;  %v1908_v14 = vpack.c.bf16 %v948_v13, %v947_v10 }
 0x159   :  { %v2383_v16 = vpop.f32.mrb[4].mxu0 }
 0x15a   :  { %v2385_v17 = vpop.f32.mrb[5].mxu0 }
 0x15b   :  { %v214_v55 = vadd.f32 %v2347_v59, %v2385_v17  ;;  %v950_v17 = vld [vmem:[#allocation12 + $0x38] sm:$0xff] }
 0x15d   :  { %v2387_v18 = vpop.f32.mrb[6].mxu0 }
 0x15e   :  { %v2389_v19 = vpop.f32.mrb[7].mxu0 }
 0x161   :  { %v2358_v12 = vpop.eup %1945 }
 0x162   :  { %1420 = vmatmul.mubr.msk.f32.vlgmr.msra.gmra.mrb[8].mxu0 %vm2354_vm2, %v2358_v12  ;;  %v337_v30 = vsel %vm2354_vm2, %v2358_v12, 0.0 }
 0x163   :  { %1782 = vmatpush3.bf16.msra.mxu0 %v2274_v9  ;;  %1489 = vmatprep.mubr.msk.f32.mxu0 %vm2149_vm0, %v2150_v1 }
 0x164   :  { %1783 = vmatprep.subr.bf16.mxu0 %v2148_v0 }
 0x167   :  { %1785 = vmatpush3.bf16.msra.mxu0 %v2277_v15 }
 0x168   :  { %1786 = vmatprep.subr.bf16.mxu0 %v2148_v0 }
 0x16b   :  { %1788 = vmatpush3.bf16.msra.mxu0 %v2281_v21 }
 0x16c   :  { %1789 = vmatprep.subr.bf16.mxu0 %v2148_v0 }
 0x16f   :  { %1791 = vmatpush3.bf16.msra.mxu0 %v2285_v28 }
 0x170   :  { %1792 = vmatprep.subr.bf16.mxu0 %v2148_v0 }
 0x173   :  { %1794 = vmatpush3.bf16.msra.mxu0 %v2289_v34 }
 0x174   :  { %1795 = vmatprep.subr.bf16.mxu0 %v2148_v0 }
 0x177   :  { %1797 = vmatpush3.bf16.msra.mxu0 %v2293_v40 }
 0x178   :  { %1798 = vmatprep.subr.bf16.mxu0 %v2148_v0 }
 0x17b   :  { %1800 = vmatpush3.bf16.msra.mxu0 %v2297_v46 }
 0x17c   :  { %1801 = vmatprep.subr.bf16.mxu0 %v2148_v0 }
 0x17f   :  { %1803 = vmatpush3.bf16.msra.mxu0 %v2301_v50 }
 0x180   :  { %1828 = vmatprep.subr.bf16.mxu0 %v2148_v0 }
 0x235   :  { %v407_v23 = vpop.f32.mrb[8].mxu0 }
 0x236   :  { %v411_v24 = vadd.f32 %v407_v23, %v199_v22  ;;  %v1421_v25 = vpop.f32.mrb[9].mxu0  ;;  %v951_v22 = vld [vmem:[#allocation12 + $0x40] sm:$0xff]  ;;  %v952_v23 = vld [vmem:[#allocation12 + $0x48] sm:$0xff] }
 0x237   :  { %v953_v25 = vld [vmem:[#allocation12 + $0x50] sm:$0xff] }
 0x238   :  { %1947 = vtanh.f32 %v411_v24  ;;  %v1916_v24 = vpack.c.bf16 %v952_v23, %v951_v22  ;;  %v1920_v27 = vpack.c.bf16 %v954_v26, %v953_v25 }
 0x242   :  { %v1948_v29 = vpop.eup %1947 }
 0x243   :  { %v2397_v31 = vsel %vm420_vm4, %v1948_v29, %v337_v30  ;;  %v955_v29 = vld [vmem:[#allocation12 + $0x60] sm:$0xff]  ;;  %v957_v30 = vld [vmem:[#allocation12 + $0x70] sm:$0xff] }
 0x244   :  { %1455 = vmatmul.mubr.f32.vlgmr.msra.gmra.mrb[2].mxu1 %v2397_v31 }
 0x245   :  { %1806 = vmatpush3.bf16.msra.mxu1 %v2274_v9  ;;  %1524 = vmatprep.mubr.msk.f32.mxu1 %vm2149_vm0, %v2150_v1 }
 0x246   :  { %1807 = vmatprep.subr.bf16.mxu1 %v2148_v0 }
 0x249   :  { %1809 = vmatpush3.bf16.msra.mxu1 %v2277_v15 }
 0x24a   :  { %1810 = vmatprep.subr.bf16.mxu1 %v2148_v0 }
 0x24d   :  { %1812 = vmatpush3.bf16.msra.mxu1 %v2281_v21 }
 0x24e   :  { %1813 = vmatprep.subr.bf16.mxu1 %v2148_v0 }
 0x251   :  { %1815 = vmatpush3.bf16.msra.mxu1 %v2285_v28 }
 0x252   :  { %1816 = vmatprep.subr.bf16.mxu1 %v2148_v0 }
 0x255   :  { %1818 = vmatpush3.bf16.msra.mxu1 %v2289_v34 }
 0x256   :  { %1819 = vmatprep.subr.bf16.mxu1 %v2148_v0 }
 0x259   :  { %1821 = vmatpush3.bf16.msra.mxu1 %v2293_v40 }
 0x25a   :  { %1822 = vmatprep.subr.bf16.mxu1 %v2148_v0 }
 0x25d   :  { %1824 = vmatpush3.bf16.msra.mxu1 %v2297_v46 }
 0x25e   :  { %1825 = vmatprep.subr.bf16.mxu1 %v2148_v0 }
 0x261   :  { %1827 = vmatpush3.bf16.msra.mxu1 %v2301_v50 }
 0x262   :  { %1852 = vmatprep.subr.bf16.mxu1 %v2148_v0 }
 0x317   :  { %v492_v35 = vpop.f32.mrb[2].mxu1 }
 0x318   :  { %v496_v36 = vadd.f32 %v492_v35, %v204_v33  ;;  %v1456_v37 = vpop.f32.mrb[3].mxu1  ;;  %v1928_v33 = vpack.c.bf16 %v958_v32, %v957_v30  ;;  %v838_v35 = vld [vmem:[#allocation7 + $0x6] sm:$0x1] }
 0x319   :  { %vm839_vm13 = vcmp.ne.f32.partialorder %v838_v35, 0.0 }
 0x31a   :  { %1949 = vtanh.f32 %v496_v36  ;;  %v224_v36 = vadd.f32 %v2347_v59, %v2389_v19 }
 0x324   :  { %v1950_v41 = vpop.eup %1949 }
 0x325   :  { %v2422_v42 = vsel %vm505_vm6, %v1950_v41, %v2397_v31  ;;  %v840_v41 = vsel %vm839_vm13, 1, %v2151_v7 }
 0x326   :  { %1490 = vmatmul.mubr.f32.vlgmr.msra.gmra.mrb[10].mxu0 %v2422_v42 }
 0x327   :  { %1830 = vmatpush3.bf16.msra.mxu0 %v2274_v9  ;;  %1559 = vmatprep.mubr.msk.f32.mxu0 %vm2149_vm0, %v2150_v1 }
 0x328   :  { %1831 = vmatprep.subr.bf16.mxu0 %v2148_v0 }
 0x32b   :  { %1833 = vmatpush3.bf16.msra.mxu0 %v2277_v15 }
 0x32c   :  { %1834 = vmatprep.subr.bf16.mxu0 %v2148_v0 }
 0x32f   :  { %1836 = vmatpush3.bf16.msra.mxu0 %v2281_v21 }
 0x330   :  { %1837 = vmatprep.subr.bf16.mxu0 %v2148_v0 }
 0x333   :  { %1839 = vmatpush3.bf16.msra.mxu0 %v2285_v28 }
 0x334   :  { %1840 = vmatprep.subr.bf16.mxu0 %v2148_v0 }
 0x337   :  { %1842 = vmatpush3.bf16.msra.mxu0 %v2289_v34 }
 0x338   :  { %1843 = vmatprep.subr.bf16.mxu0 %v2148_v0 }
 0x33b   :  { %1845 = vmatpush3.bf16.msra.mxu0 %v2293_v40 }
 0x33c   :  { %1846 = vmatprep.subr.bf16.mxu0 %v2148_v0 }
 0x33f   :  { %1848 = vmatpush3.bf16.msra.mxu0 %v2297_v46 }
 0x340   :  { %1849 = vmatprep.subr.bf16.mxu0 %v2148_v0 }
 0x343   :  { %1851 = vmatpush3.bf16.msra.mxu0 %v2301_v50 }
 0x344   :  { %1876 = vmatprep.subr.bf16.mxu0 %v2148_v0 }
 0x3f9   :  { %v577_v45 = vpop.f32.mrb[10].mxu0 }
 0x3fa   :  { %v581_v47 = vadd.f32 %v577_v45, %v209_v44  ;;  %v1491_v48 = vpop.f32.mrb[11].mxu0  ;;  %v2512_v44 = vld [vmem:[%s2559_s6] ss:$0 sm:$0xff]  ;;  %s2152_s6 = smov [#allocation14]  }
 0x3fb   :  { %s1105_s22 = sshll.u32 %s2152_s6, 4  ;;  %s1106_s22 = int_to_ptr.vmem [resolvable:$true] %s1105_s22 }
 0x3fc   :  { %1951 = vtanh.f32 %v581_v47  ;;  %s2087_s23 = scalar_lea.vmem %s1106_s22, 128  ;;  %p2092_p13 = scmp.lt.s32.totalorder %s1106_s22, %s1106_s22 }
 0x3fd   :  { %p2088_p12 = scmp.ne.s32.totalorder %s1106_s22, %s2087_s23  ;;  %p2093_p0 = scmp.lt.s32.totalorder %s2087_s23, %s2087_s23 }
 0x3ff   :  { %p2094_p1 = por %p2093_p0, %p2092_p13 }
 0x401   :  { %p2095_p2 = pnand %p2094_p1, %p2088_p12 }
 0x406   :  { %v1952_v52 = vpop.eup %1951 }
 0x407   :  { %v2448_v53 = vsel %vm590_vm8, %v1952_v52, %v2422_v42 }
 0x408   :  { %1525 = vmatmul.mubr.f32.vlgmr.msra.gmra.mrb[4].mxu1 %v2448_v53 }
 0x409   :  { %1854 = vmatpush3.bf16.msra.mxu1 %v2274_v9  ;;  %1594 = vmatprep.mubr.msk.f32.mxu1 %vm2149_vm0, %v2150_v1 }
 0x40a   :  { %1855 = vmatprep.subr.bf16.mxu1 %v2148_v0 }
 0x40d   :  { %1857 = vmatpush3.bf16.msra.mxu1 %v2277_v15 }
 0x40e   :  { %1858 = vmatprep.subr.bf16.mxu1 %v2148_v0 }
 0x411   :  { %1860 = vmatpush3.bf16.msra.mxu1 %v2281_v21 }
 0x412   :  { %1861 = vmatprep.subr.bf16.mxu1 %v2148_v0 }
 0x415   :  { %1863 = vmatpush3.bf16.msra.mxu1 %v2285_v28 }
 0x416   :  { %1864 = vmatprep.subr.bf16.mxu1 %v2148_v0 }
 0x419   :  { %1866 = vmatpush3.bf16.msra.mxu1 %v2289_v34 }
 0x41a   :  { %1867 = vmatprep.subr.bf16.mxu1 %v2148_v0 }
 0x41d   :  { %1869 = vmatpush3.bf16.msra.mxu1 %v2293_v40 }
 0x41e   :  { %1870 = vmatprep.subr.bf16.mxu1 %v2148_v0 }
 0x421   :  { %1872 = vmatpush3.bf16.msra.mxu1 %v2297_v46 }
 0x422   :  { %1873 = vmatprep.subr.bf16.mxu1 %v2148_v0 }
 0x425   :  { %1875 = vmatpush3.bf16.msra.mxu1 %v2301_v50 }
 0x4db   :  { %v662_v56 = vpop.f32.mrb[4].mxu1 }
 0x4dc   :  { %v666_v57 = vadd.f32 %v662_v56, %v214_v55  ;;  %v1526_v58 = vpop.f32.mrb[5].mxu1 }
 0x4de   :  { %1953 = vtanh.f32 %v666_v57 }
 0x4e8   :  { %v1954_v62 = vpop.eup %1953 }
 0x4e9   :  { %v2473_v63 = vsel %vm675_vm10, %v1954_v62, %v2448_v53 }
 0x4ea   :  { %1560 = vmatmul.mubr.f32.vlgmr.msra.gmra.mrb[12].mxu0 %v2473_v63 }
 0x4eb   :  { %1878 = vmatpush3.bf16.msra.mxu0 %v2274_v9  ;;  %1629 = vmatprep.mubr.msk.f32.mxu0 %vm2149_vm0, %v2150_v1  ;;  %v943_v1 = vld [vmem:[#allocation12] sm:$0xff]  ;;  %v944_v9 = vld [vmem:[#allocation12 + $0x8] sm:$0xff] }
 0x4ec   :  { %1879 = vmatprep.subr.bf16.mxu0 %v2148_v0 }
 0x4ef   :  { %1881 = vmatpush3.bf16.msra.mxu0 %v2277_v15  ;;  %v1900_v15 = vpack.c.bf16 %v944_v9, %v943_v1  ;;  %v923_v9 = vld [vmem:[#allocation7 + $0x7] sm:$0x1] }
 0x4f0   :  { %1882 = vmatprep.subr.bf16.mxu0 %v2148_v0  ;;  %vm924_vm15 = vcmp.ne.f32.partialorder %v923_v9, 0.0 }
 0x4f1   :  { %1901 = vmatprep.subr.bf16.mxu1 %v1900_v15 }
 0x4f3   :  { %1884 = vmatpush3.bf16.msra.mxu0 %v2281_v21  ;;  %v753_v21 = vld [vmem:[#allocation7 + $0x5] sm:$0x1] }
 0x4f4   :  { %1885 = vmatprep.subr.bf16.mxu0 %v2148_v0  ;;  %vm754_vm11 = vcmp.ne.f32.partialorder %v753_v21, 0.0 }
 0x4f7   :  { %1887 = vmatpush3.bf16.msra.mxu0 %v2285_v28  ;;  %v219_v28 = vadd.f32 %v2383_v16, %v2347_v59  ;;  %v949_v16 = vld [vmem:[#allocation12 + $0x30] sm:$0xff] }
 0x4f8   :  { %1888 = vmatprep.subr.bf16.mxu0 %v2148_v0  ;;  %v1912_v20 = vpack.c.bf16 %v950_v17, %v949_v16 }
 0x4fb   :  { %1890 = vmatpush3.bf16.msra.mxu0 %v2289_v34 }
 0x4fc   :  { %1891 = vmatprep.subr.bf16.mxu0 %v2148_v0 }
 0x4ff   :  { %1893 = vmatpush3.bf16.msra.mxu0 %v2293_v40  ;;  %v755_v40 = vsel %vm754_vm11, 1, %v2151_v7 }
 0x500   :  { %1894 = vmatprep.subr.bf16.mxu0 %v2148_v0 }
 0x503   :  { %1896 = vmatpush3.bf16.msra.mxu0 %v2297_v46  ;;  %v759_v46 = vrot.slane %v755_v40, %v2350_v6 }
 0x504   :  { %1897 = vmatprep.subr.bf16.mxu0 %v2148_v0  ;;  %v945_v0 = vld [vmem:[#allocation12 + $0x10] sm:$0xff] }
 0x505   :  { %vm760_vm12 = vcmp.eq.s32.totalorder %v759_v46, 1  ;;  %v1904_v5 = vpack.c.bf16 %v946_v4, %v945_v0 }
 0x507   :  { %1899 = vmatpush3.bf16.msra.mxu0 %v2301_v50 }
 0x5bd   :  { %v747_v34 = vpop.f32.mrb[12].mxu0 }
 0x5be   :  { %v751_v2 = vadd.f32 %v747_v34, %v219_v28  ;;  %v1561_v3 = vpop.f32.mrb[13].mxu0 }
 0x5c0   :  { %1955 = vtanh.f32 %v751_v2  ;;  %v925_v2 = vsel %vm924_vm15, 1, %v2151_v7 }
 0x5c1   :  { %v929_v3 = vrot.slane %v925_v2, %v2350_v6 }
 0x5c3   :  { %vm930_vm0 = vcmp.eq.s32.totalorder %v929_v3, 1 }
 0x5ca   :  { %v1956_v50 = vpop.eup %1955 }
 0x5cb   :  { %v761_v8 = vsel %vm760_vm12, %v1956_v50, %v2473_v63 }
 0x5cc   :  { %1595 = vmatmul.mubr.f32.vlgmr.msra.gmra.mrb[6].mxu1 %v761_v8 }
 0x5cd   :  { %1903 = vmatpush3.bf16.msra.mxu1 %v1900_v15  ;;  %1664 = vmatprep.mubr.msk.f32.mxu1 %vm2354_vm2, %v2358_v12  ;;  %v1924_v12 = vpack.c.bf16 %v956_v11, %v955_v29  ;;  %v229_v15 = vadd.f32 %v2387_v18, %v2347_v59 }
 0x5ce   :  { %1905 = vmatprep.subr.bf16.mxu1 %v1904_v5 }
 0x5d1   :  { %1907 = vmatpush3.bf16.msra.mxu1 %v1904_v5 }
 0x5d2   :  { %1909 = vmatprep.subr.bf16.mxu1 %v1908_v14 }
 0x5d5   :  { %1911 = vmatpush3.bf16.msra.mxu1 %v1908_v14 }
 0x5d6   :  { %1913 = vmatprep.subr.bf16.mxu1 %v1912_v20 }
 0x5d9   :  { %1915 = vmatpush3.bf16.msra.mxu1 %v1912_v20 }
 0x5da   :  { %1917 = vmatprep.subr.bf16.mxu1 %v1916_v24 }
 0x5dd   :  { %1919 = vmatpush3.bf16.msra.mxu1 %v1916_v24 }
 0x5de   :  { %1921 = vmatprep.subr.bf16.mxu1 %v1920_v27 }
 0x5e1   :  { %1923 = vmatpush3.bf16.msra.mxu1 %v1920_v27 }
 0x5e2   :  { %1925 = vmatprep.subr.bf16.mxu1 %v1924_v12 }
 0x5e5   :  { %1927 = vmatpush3.bf16.msra.mxu1 %v1924_v12 }
 0x5e6   :  { %1929 = vmatprep.subr.bf16.mxu1 %v1928_v33 }
 0x5e9   :  { %1931 = vmatpush3.bf16.msra.mxu1 %v1928_v33 }
 0x5ec   :  { %1665 = vmatmul.mubr.f32.vlgmr.msra.gmra.mrb[8].mxu1 %v2397_v31  ;;  %v844_v31 = vrot.slane %v840_v41, %v2350_v6 }
 0x5ed   :  { %1667 = vmatprep.mubr.f32.mxu1 %v2422_v42 }
 0x5ee   :  { %vm845_vm14 = vcmp.eq.s32.totalorder %v844_v31, 1 }
 0x5f0   :  { %1668 = vmatmul.mubr.f32.gmra.mrb[10].mxu1 %v2448_v53 }
 0x5f1   :  { %1670 = vmatprep.mubr.f32.mxu1 %v2473_v63 }
 0x5f4   :  { %1671 = vmatmul.mubr.f32.gmra.mrb[12].mxu1 %v761_v8 }
 0x69f   :  { %v832_v37 = vpop.f32.mrb[6].mxu1 }
 0x6a0   :  { %v836_v38 = vadd.f32 %v832_v37, %v224_v36  ;;  %v1596_v39 = vpop.f32.mrb[7].mxu1 }
 0x6a2   :  { %1957 = vtanh.f32 %v836_v38 }
 0x6ac   :  { %v1958_v42 = vpop.eup %1957 }
 0x6ad   :  { %v846_v43 = vsel %vm845_vm14, %v1958_v42, %v761_v8 }
 0x6ae   :  { %1630 = vmatmul.mubr.f32.vlgmr.msra.gmra.mrb[14].mxu0 %v846_v43  ;;  %1673 = vmatprep.mubr.f32.mxu1 %v846_v43 }
 0x6bf   :  { %v1666_v19 = vpop.f32.mrb[8].mxu1 }
 0x6c0   :  { %v1038_v45 = vadd.f32 %v1666_v19, %v2512_v44  ;;  %v1032_v47 = vpop.f32.mrb[9].mxu1 }
 0x6c1   :  { %v1033_v48 = vadd.f32 %v2512_v44, %v1032_v47 }
 0x6c2   :  { %1959 = vtanh.f32 %v1038_v45 }
 0x6c3   :  { %1961 = vtanh.f32 %v1033_v48  ;;  %v1669_v49 = vpop.f32.mrb[10].mxu1 }
 0x6c4   :  { %v1048_v51 = vadd.f32 %v1669_v49, %v2512_v44  ;;  %v1042_v52 = vpop.f32.mrb[11].mxu1 }
 0x6c5   :  { %v1043_v53 = vadd.f32 %v2512_v44, %v1042_v52 }
 0x6c6   :  { %1963 = vtanh.f32 %v1048_v51 }
 0x6c7   :  { %1965 = vtanh.f32 %v1043_v53  ;;  %v1672_v54 = vpop.f32.mrb[12].mxu1 }
 0x6c8   :  { %v1058_v55 = vadd.f32 %v1672_v54, %v2512_v44  ;;  %v1052_v56 = vpop.f32.mrb[13].mxu1 }
 0x6c9   :  { %v1053_v57 = vadd.f32 %v2512_v44, %v1052_v56 }
 0x6ca   :  { %1967 = vtanh.f32 %v1058_v55 }
 0x6cb   :  { %1969 = vtanh.f32 %v1053_v57 }
 0x6cc   :  { %v1960_v58 = vpop.eup %1959 }
 0x6cd   :  { %v1962_v60 = vpop.eup %1961  ;;  %1080 = vst [vmem:[#allocation13 + $0x8] sm:$0xff] %v1960_v58 }
 0x6ce   :  { %1079 = vst [vmem:[#allocation13] sm:$0xff] %v1962_v60 }
 0x6d0   :  { %v1964_v61 = vpop.eup %1963 }
 0x6d1   :  { %v1966_v62 = vpop.eup %1965  ;;  %1082 = vst [vmem:[#allocation13 + $0x18] sm:$0xff] %v1964_v61 }
 0x6d2   :  { %1081 = vst [vmem:[#allocation13 + $0x10] sm:$0xff] %v1966_v62 }
 0x6d4   :  { %v1968_v63 = vpop.eup %1967 }
 0x6d5   :  { %v1970_v1 = vpop.eup %1969  ;;  %1084 = vst [vmem:[#allocation13 + $0x28] sm:$0xff] %v1968_v63 }
 0x6d6   :  { %1083 = vst [vmem:[#allocation13 + $0x20] sm:$0xff] %v1970_v1 }
 0x781   :  { %v917_v21 = vpop.f32.mrb[14].mxu0 }
 0x782   :  { %v921_v28 = vadd.f32 %v917_v21, %v229_v15  ;;  %v1631_v34 = vpop.f32.mrb[15].mxu0 }
 0x784   :  { %1971 = vtanh.f32 %v921_v28 }
 0x78e   :  { %v1972_v40 = vpop.eup %1971 }
 0x78f   :  { %v931_v46 = vsel %vm930_vm0, %v1972_v40, %v846_v43 }
 0x790   :  { %1674 = vmatmul.mubr.f32.gmra.mrb[14].mxu1 %v931_v46  ;;  %934 = vst [vmem:[#allocation14] sm:$0xff] %v931_v46 }
 0x791   :  { %2098 = shalt.err (!%p2095_p2)
}
 0x792   :  { %s2099_s26 = scalar_lea.hbm %s2561_s8, 128 }
 0x793   :  { %p2100_p3 = scmp.ne.s32.totalorder %s2561_s8, %s2099_s26  ;;  %p2103_p4 = scmp.lt.u32.totalorder %s2099_s26, %s2561_s8 }
 0x795   :  { %p2105_p5 = pnand %p2103_p4, %p2100_p3 }
 0x797   :  { %2108 = shalt.err (!%p2105_p5)
}
 0x798   :  { %1108 = dma.vmem_to_hbm [thread:$0]  %s1106_s22, 128, %s2561_s8, [#allocation15]  }
 0x799   :  { %s2153_s10 = smov [#allocation13]  }
 0x79a   :  { %s1092_s11 = sshll.u32 %s2153_s10, 4  ;;  %s1093_s11 = int_to_ptr.vmem [resolvable:$true] %s1092_s11 }
 0x79b   :  { %s2109_s12 = scalar_lea.vmem %s1093_s11, 1024  ;;  %p2114_p7 = scmp.lt.s32.totalorder %s1093_s11, %s1093_s11 }
 0x79c   :  { %p2110_p6 = scmp.ne.s32.totalorder %s1093_s11, %s2109_s12  ;;  %p2115_p8 = scmp.lt.s32.totalorder %s2109_s12, %s2109_s12 }
 0x79e   :  { %p2116_p9 = por %p2115_p8, %p2114_p7 }
 0x7a0   :  { %p2117_p10 = pnand %p2116_p9, %p2110_p6 }
 0x863   :  { %v1675_v59 = vpop.f32.mrb[14].mxu1 }
 0x864   :  { %v1068_v6 = vadd.f32 %v1675_v59, %v2512_v44  ;;  %v1062_v7 = vpop.f32.mrb[15].mxu1 }
 0x865   :  { %v1063_v18 = vadd.f32 %v2512_v44, %v1062_v7 }
 0x866   :  { %1973 = vtanh.f32 %v1068_v6 }
 0x867   :  { %1975 = vtanh.f32 %v1063_v18 }
 0x870   :  { %v1974_v0 = vpop.eup %1973 }
 0x871   :  { %v1976_v4 = vpop.eup %1975  ;;  %1086 = vst [vmem:[#allocation13 + $0x38] sm:$0xff] %v1974_v0 }
 0x872   :  { %1085 = vst [vmem:[#allocation13 + $0x30] sm:$0xff] %v1976_v4 }
 0x873   :  { %2120 = shalt.err (!%p2117_p10)
}
 0x874   :  { %s2121_s14 = scalar_lea.hbm %s2560_s7, 1024 }
 0x875   :  { %p2122_p11 = scmp.ne.s32.totalorder %s2560_s7, %s2121_s14  ;;  %p2125_p12 = scmp.lt.u32.totalorder %s2121_s14, %s2560_s7 }
 0x877   :  { %p2127_p13 = pnand %p2125_p12, %p2122_p11 }
 0x879   :  { %2130 = shalt.err (!%p2127_p13)
}
 0x87a   :  { %1098 = dma.vmem_to_hbm [thread:$0]  %s1093_s11, 1024, %s2560_s7, [#allocation6], %s2144_s28, %s2144_s28, %s2145_s29  }
 0x87b   :  { %2137 = dma.done.wait [#allocation6], 1024  }
 0x87c   :  { %2138 = vsyncadd [#allocation6], 4294966272 }
 0x87d   :  { %2139 = dma.done.wait [#allocation15], 128  }
 0x87e   :  { %2140 = vsyncadd [#allocation15], 4294967168 }
 0x87f   :  { %1115 = vsyncpa [#allocation5], 1 }
 0x880   :  { %1116 = vsyncpa [#allocation8], 1 }
 0x881   :  { %1117 = vsyncpa [#allocation11], 1 }
 0x882   :  { %1118 = vsyncpa [#allocation6], 1 }
 0x883   :  { %1119 = vsyncpa [#allocation15], 1 }

</bundles_post_ra>
